<compile_context>
chip_gen: v7x
topology: tpu7x:2x2x1
jax: 0.10.0
libtpu: 0.0.40
codegen_flags: <defaults>
</compile_context>

<pallas_src>
import math

import jax
import jax.numpy as jnp
from jax.experimental import pallas as pl
from jax.experimental.pallas import tpu as pltpu


def _round_up(x, m):
    return ((x + m - 1) // m) * m


def _gelu(x):
    # TODO(synk): PyTorch nn.GELU default is exact (erf); tanh approximation is used for
    # guaranteed Mosaic lowering (max abs activation diff ~1e-3).
    c = math.sqrt(2.0 / math.pi)
    return 0.5 * x * (1.0 + jnp.tanh(c * (x + 0.044715 * x * x * x)))


def _mamba_cross_kernel(ssum_ref, wtw_ref, aux_ref, wc_ref, w1_ref, w2_ref, hb_ref,
                        out_ref):
    f32, bf16 = jnp.float32, jnp.bfloat16
    bb = ssum_ref.shape[0]
    E = wtw_ref.shape[1]
    A = aux_ref.shape[1]
    HP = w1_ref.shape[1]
    ADP = w2_ref.shape[1]

    aux = aux_ref[...]                    # (3, A, E) f32: [scale, enc_bias, dec_bias]
    hb = hb_ref[...]                      # (2, HP)   f32: [b1 ; b2 (first ADP lanes)]

    # proj[b] = (sum_t states[b]) @ (w_tok @ we)          (bb, Ds) @ (Ds, E) on the MXU
    proj = jnp.dot(ssum_ref[...], wtw_ref[...], preferred_element_type=f32)   # (bb, E)

    # encoder stand-in on the A action rows: the causal prefix-mean over the state rows
    # collapses to scale[j] * proj[b]; the batch-invariant part (pos_emb, tok-emb bias,
    # action-token cumsum) is pre-folded into enc_bias.  Scale is applied in f32.
    enc = _gelu(proj[:, None, :] * aux[0][None, :, :] + aux[1][None, :, :])   # (bb, A, E)

    # decoder stand-in, cross-conditioned on the encoder output
    # (act_seq @ Wd + bd is batch-invariant and lives in dec_bias = aux[2]).
    dec_pre = jnp.dot(enc.reshape(bb * A, E).astype(bf16), wc_ref[...],
                      preferred_element_type=f32)                             # (bb*A, E)
    dec = _gelu(dec_pre.reshape(bb, A, E) + aux[2][None, :, :]).reshape(bb * A, E)

    # action-prediction MLP head (hidden padded to HP=128 lanes, output to ADP lanes)
    h = _gelu(jnp.dot(dec.astype(bf16), w1_ref[...],
                      preferred_element_type=f32) + hb[0:1, :])               # (bb*A, HP)
    pred = jnp.dot(h.astype(bf16), w2_ref[...],
                   preferred_element_type=f32) + hb[1:2, :ADP]                # (bb*A, ADP)
    out_ref[...] = pred.astype(out_ref.dtype)


def mamba_cross_forward(states, params, *, batch_block=None):
    """Fused MambaCross forward.  Returns pred_actions of shape (B, A, action_dim)."""
    f32, bf16 = jnp.float32, jnp.bfloat16
    B, t, Ds = states.shape
    E = params["w_tok"].shape[1]
    A = params["action_token"].shape[0]
    H = params["w1"].shape[1]
    Ad = params["w2"].shape[1]
    HP = 128                               # MLP hidden padded to one full lane width
    ADP = max(8, _round_up(Ad, 8))         # narrow padded output slab (not 128 lanes)
    assert H <= HP and Ad <= ADP

    # ---- batch tiling -------------------------------------------------------------
    # bb is a multiple of 8 (sublane-aligned state-sum / output blocks).  For B >= 16
    # we guarantee >= 2 grid steps so the "parallel" axis can be split across v7x's
    # two TensorCores; tiny batches get one zero-padded block.
    if batch_block is not None:
        bb = max(8, _round_up(int(batch_block), 8))
    elif B >= 16:
        bb = min(max(16, (2048 // max(A, 1)) // 16 * 16),   # ~2k activation rows/step
                 _round_up(B, 16) // 2)
    else:
        bb = _round_up(B, 8)
    B_pad = _round_up(B, bb)
    nb = B_pad // bb

    # ---- hoisted, batch-invariant precompute (tiny one-off XLA ops) ----------------
    we = params["we"].astype(f32)
    wc = params["wc"].astype(f32)
    wd = params["wd"].astype(f32)
    pos = params["pos_emb"][0, :t, :].astype(f32)                       # (t, E)
    scale = 1.0 / jnp.arange(t + 1, t + A + 1, dtype=f32)               # 1/(t+1+j)
    cum_atok = jnp.cumsum(params["action_token"].astype(f32), axis=0)   # (A, E)
    bias_sum = jnp.sum(pos + params["b_tok"].astype(f32), axis=0, keepdims=True)
    enc_bias = (scale[:, None] * (bias_sum + cum_atok)) @ we + params["be"].astype(f32)
    dec_bias = params["action_noise_token"].astype(f32) @ wd + params["bd"].astype(f32)
    aux = jnp.stack([jnp.broadcast_to(scale[:, None], (A, E)),
                     enc_bias, dec_bias], axis=0)                        # (3, A, E) f32

    wtw = (params["w_tok"].astype(f32) @ we).astype(bf16)                # fold tok_emb->We
    wc_b = wc.astype(bf16)
    w1p = jnp.zeros((E, HP), f32).at[:, :H].set(params["w1"].astype(f32)).astype(bf16)
    w2p = jnp.zeros((HP, ADP), f32).at[:H, :Ad].set(params["w2"].astype(f32)).astype(bf16)
    hb = jnp.zeros((2, HP), f32)
    hb = hb.at[0, :H].set(params["b1"].astype(f32).reshape(-1))
    hb = hb.at[1, :Ad].set(params["b2"].astype(f32).reshape(-1))

    # The causal state aggregation only needs sum_t states  (eliminates the old
    # O(bb^2) block-diagonal mixing matmul and the narrow (bb*t, Ds) DMA).
    ssum = jnp.sum(states.astype(f32), axis=1)                           # (B, Ds)
    if B_pad != B:
        ssum = jnp.concatenate([ssum, jnp.zeros((B_pad - B, Ds), f32)], axis=0)
    ssum = ssum.astype(bf16)

    cost = pl.CostEstimate(
        flops=2 * B_pad * Ds * E + 2 * B_pad * A * (E * E + E * HP + HP * ADP),
        transcendentals=B_pad * A * (2 * E + HP),
        bytes_accessed=(ssum.size * 2 + wtw.size * 2 + aux.size * 4 + wc_b.size * 2
                        + w1p.size * 2 + w2p.size * 2 + hb.size * 4
                        + B_pad * A * ADP * 4))

    # NOTE: the grid-invariant weight operands total < 64 KiB even double-buffered, so
    # pl.Buffered(1) single-buffering is skipped here (negligible VMEM win at this size).
    out = pl.pallas_call(
        _mamba_cross_kernel,
        out_shape=jax.ShapeDtypeStruct((B_pad * A, ADP), f32),
        grid=(nb,),
        in_specs=[
            pl.BlockSpec((bb, Ds), lambda i: (i, 0)),       # per-batch state sums
            pl.BlockSpec((Ds, E), lambda i: (0, 0)),        # w_tok @ we (folded)
            pl.BlockSpec((3, A, E), lambda i: (0, 0, 0)),   # [scale, enc_bias, dec_bias]
            pl.BlockSpec((E, E), lambda i: (0, 0)),         # Wc
            pl.BlockSpec((E, HP), lambda i: (0, 0)),        # W1 (hidden padded to 128)
            pl.BlockSpec((HP, ADP), lambda i: (0, 0)),      # W2 (narrow padded output)
            pl.BlockSpec((2, HP), lambda i: (0, 0)),        # [b1 ; b2]
        ],
        out_specs=pl.BlockSpec((bb * A, ADP), lambda i: (i, 0)),
        compiler_params=pltpu.CompilerParams(
            dimension_semantics=("parallel",),
            vmem_limit_bytes=32 * 1024 * 1024),
        cost_estimate=cost,
    )(ssum, wtw, aux, wc_b, w1p, w2p, hb)

    return out[:, :Ad].reshape(B_pad, A, Ad)[:B]


def mamba_cross_reference(states, params):
    """Module-literal (unfused, all-f32) forward with the same encoder/decoder stand-ins."""
    f32 = jnp.float32
    B, t, _ = states.shape
    E = params["w_tok"].shape[1]
    A = params["action_token"].shape[0]
    S = t + A

    state_emb = states.astype(f32) @ params["w_tok"] + params["b_tok"]
    state_x = state_emb + params["pos_emb"][:, :t, :]                 # dropout = identity
    action_seq = jnp.broadcast_to(params["action_token"], (B, A, E))
    input_seq = jnp.concatenate([state_x, action_seq], axis=1)        # (B, S, E)

    # encoder stand-in: causal prefix-mean, then row-wise projection
    counts = jnp.arange(1, S + 1, dtype=f32)[None, :, None]
    causal_mean = jnp.cumsum(input_seq, axis=1) / counts
    enc = _gelu(causal_mean @ params["we"] + params["be"])

    # decoder stand-in: row-wise projection of act_seq, cross-conditioned on enc
    state_tok = jnp.broadcast_to(params["state_token"][:t], (B, t, E))
    noise_seq = jnp.broadcast_to(params["action_noise_token"], (B, A, E))
    act_seq = jnp.concatenate([state_tok, noise_seq], axis=1)
    dec = _gelu(act_seq @ params["wd"] + enc @ params["wc"] + params["bd"])

    # action_pred MLP, keep only the action rows — exactly as the module
    h = _gelu(dec @ params["w1"] + params["b1"])
    pred = h @ params["w2"] + params["b2"]
    return pred[:, t:, :]


def make_params(key, state_dim, action_dim, embed_dim, obs_seq_len, action_seq_len,
                goal_seq_len=0, hidden=100, init_std=0.2):
    # The module's _init_weights uses N(0, 0.02) weights with zero biases / pos_emb.
    # Here every parameter gets N(0, init_std) values purely so the numerical check is
    # sensitive to the state path and to every folded term.
    seq_size = goal_seq_len + obs_seq_len - 1 + action_seq_len
    ks = jax.random.split(key, 15)
    n = lambda k, shape: (init_std * jax.random.normal(k, shape)).astype(jnp.float32)
    return dict(
        w_tok=n(ks[0], (state_dim, embed_dim)), b_tok=n(ks[9], (1, embed_dim)),
        pos_emb=n(ks[10], (1, seq_size, embed_dim)),
        action_token=n(ks[1], (action_seq_len, embed_dim)),
        action_noise_token=n(ks[2], (action_seq_len, embed_dim)),
        state_token=n(ks[3], (obs_seq_len, embed_dim)),
        we=n(ks[4], (embed_dim, embed_dim)), be=n(ks[11], (1, embed_dim)),
        wd=n(ks[5], (embed_dim, embed_dim)),
        wc=n(ks[6], (embed_dim, embed_dim)), bd=n(ks[12], (1, embed_dim)),
        w1=n(ks[7], (embed_dim, hidden)), b1=n(ks[13], (1, hidden)),
        w2=n(ks[8], (hidden, action_dim)), b2=n(ks[14], (1, action_dim)),
    )


if __name__ == "__main__":
    # small config consistent with the module
    batch = 2
    state_dim = 10
    action_dim = 6
    embed_dim = 32
    obs_seq_len = 4        # t
    action_seq_len = 8     # A
    goal_seq_len = 0       # goal_conditioned=False

    key = jax.random.PRNGKey(0)
    kp, kx = jax.random.split(key)
    params = make_params(kp, state_dim, action_dim, embed_dim,
                         obs_seq_len, action_seq_len, goal_seq_len)
    states = jax.random.normal(kx, (batch, obs_seq_len, state_dim), dtype=jnp.float32)

    pred = mamba_cross_forward(states, params)
    jax.block_until_ready(pred)
    assert pred.shape == (batch, action_seq_len, action_dim)

    # the output must actually depend on the input states
    batch_diff = float(jnp.max(jnp.abs(pred[0] - pred[1])))
    assert batch_diff > 1e-4, f"output does not depend on states (diff={batch_diff:.3e})"

    # numerical check vs. the module-literal f32 reference.  The only quantization in
    # the kernel is bf16 matmul operands with f32 accumulation (scale/biases stay f32),
    # so ~4% relative tolerance bounds four chained bf16 matmul layers at init_std=0.2.
    ref = mamba_cross_reference(states, params)
    err = float(jnp.max(jnp.abs(pred - ref)))
    tol = 2e-3 + 4e-2 * float(jnp.max(jnp.abs(ref)))
    assert err <= tol, f"kernel/reference mismatch: max|diff|={err:.3e} tol={tol:.3e}"

    print("KERNEL_OK")
</pallas_src>

<mosaic_0001>
module attributes {stable_mosaic.version = 11 : i64} {
  func.func @_mamba_cross_kernel(%arg0: i32, %arg1: memref<8x10xbf16, #tpu.memory_space<vmem>>, %arg2: memref<10x32xbf16, #tpu.memory_space<vmem>>, %arg3: memref<3x8x32xf32, #tpu.memory_space<vmem>>, %arg4: memref<32x32xbf16, #tpu.memory_space<vmem>>, %arg5: memref<32x128xbf16, #tpu.memory_space<vmem>>, %arg6: memref<128x8xbf16, #tpu.memory_space<vmem>>, %arg7: memref<2x128xf32, #tpu.memory_space<vmem>>, %arg8: memref<64x8xf32, #tpu.memory_space<vmem>>) attributes {dimension_semantics = [#tpu.dimension_semantics<parallel>], iteration_bounds = array<i64: 1>, scalar_prefetch = 0 : i64, scratch_operands = 0 : i64, tpu.core_type = #tpu.core_type<tc>, window_params = [{transform_indices = @transform_0, window_bounds = array<i64: 8, 10>}, {pipeline_mode = #tpu.pipeline_mode<synchronous>, transform_indices = @transform_1, window_bounds = array<i64: 10, 32>}, {pipeline_mode = #tpu.pipeline_mode<synchronous>, transform_indices = @transform_2, window_bounds = array<i64: 3, 8, 32>}, {pipeline_mode = #tpu.pipeline_mode<synchronous>, transform_indices = @transform_3, window_bounds = array<i64: 32, 32>}, {pipeline_mode = #tpu.pipeline_mode<synchronous>, transform_indices = @transform_4, window_bounds = array<i64: 32, 128>}, {pipeline_mode = #tpu.pipeline_mode<synchronous>, transform_indices = @transform_5, window_bounds = array<i64: 128, 8>}, {pipeline_mode = #tpu.pipeline_mode<synchronous>, transform_indices = @transform_6, window_bounds = array<i64: 2, 128>}, {transform_indices = @transform_7, window_bounds = array<i64: 64, 8>}]} {
    %c0 = arith.constant 0 : index
    %c0_0 = arith.constant 0 : index
    %c0_1 = arith.constant 0 : index
    %0 = vector.load %arg3[%c0, %c0_0, %c0_1] : memref<3x8x32xf32, #tpu.memory_space<vmem>>, vector<3x8x32xf32>
    %c0_2 = arith.constant 0 : index
    %c0_3 = arith.constant 0 : index
    %1 = vector.load %arg7[%c0_2, %c0_3] : memref<2x128xf32, #tpu.memory_space<vmem>>, vector<2x128xf32>
    %c0_4 = arith.constant 0 : index
    %c0_5 = arith.constant 0 : index
    %2 = vector.load %arg1[%c0_4, %c0_5] : memref<8x10xbf16, #tpu.memory_space<vmem>>, vector<8x10xbf16>
    %c0_6 = arith.constant 0 : index
    %c0_7 = arith.constant 0 : index
    %3 = vector.load %arg2[%c0_6, %c0_7] : memref<10x32xbf16, #tpu.memory_space<vmem>>, vector<10x32xbf16>
    %cst = arith.constant dense<0.000000e+00> : vector<8x32xf32>
    %4 = tpu.matmul %2, %3, %cst {dimension_numbers = #tpu.dot_dimension_numbers<[1], [0], [0], [1], [0, 0, 1, 1], [], []>} : vector<8x10xbf16>, vector<10x32xbf16>, vector<8x32xf32> -> vector<8x32xf32>
    %5 = vector.shape_cast %4 : vector<8x32xf32> to vector<8x1x32xf32>
    %6 = vector.extract_strided_slice %0 {offsets = [0, 0, 0], sizes = [1, 8, 32], strides = [1, 1, 1]} : vector<3x8x32xf32> to vector<1x8x32xf32>
    %7 = vector.shape_cast %6 : vector<1x8x32xf32> to vector<8x32xf32>
    %8 = vector.shape_cast %7 : vector<8x32xf32> to vector<1x8x32xf32>
    %9 = vector.broadcast %5 : vector<8x1x32xf32> to vector<8x8x32xf32>
    %10 = vector.broadcast %8 : vector<1x8x32xf32> to vector<8x8x32xf32>
    %11 = arith.mulf %9, %10 : vector<8x8x32xf32>
    %12 = vector.extract_strided_slice %0 {offsets = [1, 0, 0], sizes = [1, 8, 32], strides = [1, 1, 1]} : vector<3x8x32xf32> to vector<1x8x32xf32>
    %13 = vector.shape_cast %12 : vector<1x8x32xf32> to vector<8x32xf32>
    %14 = vector.shape_cast %13 : vector<8x32xf32> to vector<1x8x32xf32>
    %15 = vector.broadcast %14 : vector<1x8x32xf32> to vector<8x8x32xf32>
    %16 = arith.addf %11, %15 : vector<8x8x32xf32>
    %cst_8 = arith.constant 5.000000e-01 : f32
    %17 = vector.broadcast %cst_8 : f32 to vector<8x8x32xf32>
    %18 = arith.mulf %17, %16 : vector<8x8x32xf32>
    %cst_9 = arith.constant 4.471500e-02 : f32
    %19 = vector.broadcast %cst_9 : f32 to vector<8x8x32xf32>
    %20 = arith.mulf %19, %16 : vector<8x8x32xf32>
    %21 = arith.mulf %20, %16 : vector<8x8x32xf32>
    %22 = arith.mulf %21, %16 : vector<8x8x32xf32>
    %23 = arith.addf %16, %22 : vector<8x8x32xf32>
    %cst_10 = arith.constant 0.797884583 : f32
    %24 = vector.broadcast %cst_10 : f32 to vector<8x8x32xf32>
    %25 = arith.mulf %24, %23 : vector<8x8x32xf32>
    %26 = math.tanh %25 : vector<8x8x32xf32>
    %cst_11 = arith.constant 1.000000e+00 : f32
    %27 = vector.broadcast %cst_11 : f32 to vector<8x8x32xf32>
    %28 = arith.addf %27, %26 : vector<8x8x32xf32>
    %29 = arith.mulf %18, %28 : vector<8x8x32xf32>
    %30 = vector.shape_cast %29 : vector<8x8x32xf32> to vector<64x32xf32>
    %31 = arith.truncf %30 : vector<64x32xf32> to vector<64x32xbf16>
    %c0_12 = arith.constant 0 : index
    %c0_13 = arith.constant 0 : index
    %32 = vector.load %arg4[%c0_12, %c0_13] : memref<32x32xbf16, #tpu.memory_space<vmem>>, vector<32x32xbf16>
    %cst_14 = arith.constant dense<0.000000e+00> : vector<64x32xf32>
    %33 = tpu.matmul %31, %32, %cst_14 {dimension_numbers = #tpu.dot_dimension_numbers<[1], [0], [0], [1], [0, 0, 1, 1], [], []>} : vector<64x32xbf16>, vector<32x32xbf16>, vector<64x32xf32> -> vector<64x32xf32>
    %34 = vector.shape_cast %33 : vector<64x32xf32> to vector<8x8x32xf32>
    %35 = vector.extract_strided_slice %0 {offsets = [2, 0, 0], sizes = [1, 8, 32], strides = [1, 1, 1]} : vector<3x8x32xf32> to vector<1x8x32xf32>
    %36 = vector.shape_cast %35 : vector<1x8x32xf32> to vector<8x32xf32>
    %37 = vector.shape_cast %36 : vector<8x32xf32> to vector<1x8x32xf32>
    %38 = vector.broadcast %37 : vector<1x8x32xf32> to vector<8x8x32xf32>
    %39 = arith.addf %34, %38 : vector<8x8x32xf32>
    %cst_15 = arith.constant 5.000000e-01 : f32
    %40 = vector.broadcast %cst_15 : f32 to vector<8x8x32xf32>
    %41 = arith.mulf %40, %39 : vector<8x8x32xf32>
    %cst_16 = arith.constant 4.471500e-02 : f32
    %42 = vector.broadcast %cst_16 : f32 to vector<8x8x32xf32>
    %43 = arith.mulf %42, %39 : vector<8x8x32xf32>
    %44 = arith.mulf %43, %39 : vector<8x8x32xf32>
    %45 = arith.mulf %44, %39 : vector<8x8x32xf32>
    %46 = arith.addf %39, %45 : vector<8x8x32xf32>
    %cst_17 = arith.constant 0.797884583 : f32
    %47 = vector.broadcast %cst_17 : f32 to vector<8x8x32xf32>
    %48 = arith.mulf %47, %46 : vector<8x8x32xf32>
    %49 = math.tanh %48 : vector<8x8x32xf32>
    %cst_18 = arith.constant 1.000000e+00 : f32
    %50 = vector.broadcast %cst_18 : f32 to vector<8x8x32xf32>
    %51 = arith.addf %50, %49 : vector<8x8x32xf32>
    %52 = arith.mulf %41, %51 : vector<8x8x32xf32>
    %53 = vector.shape_cast %52 : vector<8x8x32xf32> to vector<64x32xf32>
    %54 = arith.truncf %53 : vector<64x32xf32> to vector<64x32xbf16>
    %c0_19 = arith.constant 0 : index
    %c0_20 = arith.constant 0 : index
    %55 = vector.load %arg5[%c0_19, %c0_20] : memref<32x128xbf16, #tpu.memory_space<vmem>>, vector<32x128xbf16>
    %cst_21 = arith.constant dense<0.000000e+00> : vector<64x128xf32>
    %56 = tpu.matmul %54, %55, %cst_21 {dimension_numbers = #tpu.dot_dimension_numbers<[1], [0], [0], [1], [0, 0, 1, 1], [], []>} : vector<64x32xbf16>, vector<32x128xbf16>, vector<64x128xf32> -> vector<64x128xf32>
    %57 = vector.extract_strided_slice %1 {offsets = [0, 0], sizes = [1, 128], strides = [1, 1]} : vector<2x128xf32> to vector<1x128xf32>
    %58 = vector.broadcast %57 : vector<1x128xf32> to vector<64x128xf32>
    %59 = arith.addf %56, %58 : vector<64x128xf32>
    %cst_22 = arith.constant 5.000000e-01 : f32
    %60 = vector.broadcast %cst_22 : f32 to vector<64x128xf32>
    %61 = arith.mulf %60, %59 : vector<64x128xf32>
    %cst_23 = arith.constant 4.471500e-02 : f32
    %62 = vector.broadcast %cst_23 : f32 to vector<64x128xf32>
    %63 = arith.mulf %62, %59 : vector<64x128xf32>
    %64 = arith.mulf %63, %59 : vector<64x128xf32>
    %65 = arith.mulf %64, %59 : vector<64x128xf32>
    %66 = arith.addf %59, %65 : vector<64x128xf32>
    %cst_24 = arith.constant 0.797884583 : f32
    %67 = vector.broadcast %cst_24 : f32 to vector<64x128xf32>
    %68 = arith.mulf %67, %66 : vector<64x128xf32>
    %69 = math.tanh %68 : vector<64x128xf32>
    %cst_25 = arith.constant 1.000000e+00 : f32
    %70 = vector.broadcast %cst_25 : f32 to vector<64x128xf32>
    %71 = arith.addf %70, %69 : vector<64x128xf32>
    %72 = arith.mulf %61, %71 : vector<64x128xf32>
    %73 = arith.truncf %72 : vector<64x128xf32> to vector<64x128xbf16>
    %c0_26 = arith.constant 0 : index
    %c0_27 = arith.constant 0 : index
    %74 = vector.load %arg6[%c0_26, %c0_27] : memref<128x8xbf16, #tpu.memory_space<vmem>>, vector<128x8xbf16>
    %cst_28 = arith.constant dense<0.000000e+00> : vector<64x8xf32>
    %75 = tpu.matmul %73, %74, %cst_28 {dimension_numbers = #tpu.dot_dimension_numbers<[1], [0], [0], [1], [0, 0, 1, 1], [], []>} : vector<64x128xbf16>, vector<128x8xbf16>, vector<64x8xf32> -> vector<64x8xf32>
    %76 = vector.extract_strided_slice %1 {offsets = [1, 0], sizes = [1, 8], strides = [1, 1]} : vector<2x128xf32> to vector<1x8xf32>
    %77 = vector.broadcast %76 : vector<1x8xf32> to vector<64x8xf32>
    %78 = arith.addf %75, %77 : vector<64x8xf32>
    %c0_29 = arith.constant 0 : index
    %c0_30 = arith.constant 0 : index
    %79 = vector.load %arg8[%c0_29, %c0_30] : memref<64x8xf32, #tpu.memory_space<vmem>>, vector<64x8xf32>
    tpu.vector_store %arg8[%c0_29, %c0_30], %78 {strides = array<i32>} : memref<64x8xf32, #tpu.memory_space<vmem>>, vector<64x8xf32>,
    return
  }
  func.func @transform_0(%arg0: i32) -> (i32, i32) {
    %c0_i32 = arith.constant 0 : i32
    %c0_i32_0 = arith.constant 0 : i32
    return %arg0, %c0_i32 : i32, i32
  }
  func.func @transform_1(%arg0: i32) -> (i32, i32) {
    %c0_i32 = arith.constant 0 : i32
    %c0_i32_0 = arith.constant 0 : i32
    %c0_i32_1 = arith.constant 0 : i32
    return %c0_i32, %c0_i32_0 : i32, i32
  }
  func.func @transform_2(%arg0: i32) -> (i32, i32, i32) {
    %c0_i32 = arith.constant 0 : i32
    %c0_i32_0 = arith.constant 0 : i32
    %c0_i32_1 = arith.constant 0 : i32
    %c0_i32_2 = arith.constant 0 : i32
    return %c0_i32, %c0_i32_0, %c0_i32_1 : i32, i32, i32
  }
  func.func @transform_3(%arg0: i32) -> (i32, i32) {
    %c0_i32 = arith.constant 0 : i32
    %c0_i32_0 = arith.constant 0 : i32
    %c0_i32_1 = arith.constant 0 : i32
    return %c0_i32, %c0_i32_0 : i32, i32
  }
  func.func @transform_4(%arg0: i32) -> (i32, i32) {
    %c0_i32 = arith.constant 0 : i32
    %c0_i32_0 = arith.constant 0 : i32
    %c0_i32_1 = arith.constant 0 : i32
    return %c0_i32, %c0_i32_0 : i32, i32
  }
  func.func @transform_5(%arg0: i32) -> (i32, i32) {
    %c0_i32 = arith.constant 0 : i32
    %c0_i32_0 = arith.constant 0 : i32
    %c0_i32_1 = arith.constant 0 : i32
    return %c0_i32, %c0_i32_0 : i32, i32
  }
  func.func @transform_6(%arg0: i32) -> (i32, i32) {
    %c0_i32 = arith.constant 0 : i32
    %c0_i32_0 = arith.constant 0 : i32
    %c0_i32_1 = arith.constant 0 : i32
    return %c0_i32, %c0_i32_0 : i32, i32
  }
  func.func @transform_7(%arg0: i32) -> (i32, i32) {
    %c0_i32 = arith.constant 0 : i32
    %c0_i32_0 = arith.constant 0 : i32
    return %arg0, %c0_i32 : i32, i32
  }
}

</mosaic_0001>

<bundles_post_ra>
// kernel: tpu_custom_call.1
= control target key start
LH: loop header
LB: loop body
LE: loop exit
PB: predicated region body
PF: predicated region fallthrough
CT: control target
= control target key end

     0   :  { %vm43_vm0 = vcmask 1044480   ;;  %v932_v0 = vmov 0.0   ;;  %vm933_vm1 = vmmov 0   ;;  %vm39_vm2 = vcmask 80896   ;;  %s1215_s1 = inlined_call_operand.vmem [shape: bf16[10,32], index: 1, kind: input, shape index: {}]   ;;  %s1216_s0 = inlined_call_operand.vmem [shape: bf16[8,10], index: 0, kind: input, shape index: {}]   ;;  %s1217_s3 = inlined_call_operand.vmem [shape: bf16[32,32], index: 3, kind: input, shape index: {}]   ;;  %s1218_s2 = inlined_call_operand.vmem [shape: f32[3,8,32], index: 2, kind: input, shape index: {}]   ;;  %s1219_s4 = inlined_call_operand.vmem [shape: bf16[32,128], index: 4, kind: input, shape index: {}]   ;;  %s1220_s5 = inlined_call_operand.vmem [shape: bf16[128,8], index: 5, kind: input, shape index: {}]   ;;  %s1221_s6 = inlined_call_operand.vmem [shape: f32[2,128], index: 6, kind: input, shape index: {}]   ;;  %s1222_s7 = inlined_call_operand.vmem [shape: f32[64,8], index: 7, kind: output, shape index: {}]  }
   0x1   :  { %814 = vmatprep.subr.bf16.mxu0 %v932_v0  ;;  %v871_v1 = vld [vmem:[%s1215_s1] sm:$0x1f]   ;;  %816 = vmatprep.mubr.msk.bf16.mxu0 %vm933_vm1, %v932_v0  ;;  %v873_v5 = vld [vmem:[%s1217_s3 + $0x8] sm:$0xff]   ;;  %v934_v6 = vmov 1966171168   ;;  %v92_v8 = vlaneseq  ;;  %vm285_vm3 = vcmask 261120  }
   0x2   :  { %v45_v2 = vsel %vm43_vm0, %v871_v1, 0  ;;  %v31_v3 = vld [vmem:[%s1216_s0] sm:$0xf]  ;;  %v90_v7 = vunpack.c.l.s4 %v934_v6  ;;  %v28_v28 = vld [vmem:[%s1218_s2 + $0x8] sm:$0xff]  ;;  %vm753_vm4 = vcmask 64512  }
   0x3   :  { %815 = vmatpush3.bf16.msra.mxu0 %v45_v2  ;;  %v872_v4 = vld [vmem:[%s1217_s3] sm:$0xff]   ;;  %v987_v10 = vshrl.u32 %v92_v8, 7 }
   0x4   :  { %820 = vmatprep.subr.bf16.mxu0 %v872_v4  ;;  %v91_v9 = vunpack.c.0.s8 %v90_v7  ;;  %v27_v22 = vld [vmem:[%s1218_s2] sm:$0xff] }
   0x5   :  { %v991_v16 = vsub.s32 0, %v987_v10 }
   0x6   :  { %817 = vmatmul.mubr.msk.bf16.vlgmr.msra.gmra.mrb[0].mxu0 %vm39_vm2, %v31_v3  ;;  %v94_v11 = vsub.s32 %v91_v9, %v987_v10 }
   0x7   :  { %821 = vmatpush3.bf16.msra.mxu0 %v872_v4 }
   0x8   :  { %822 = vmatprep.subr.bf16.mxu0 %v873_v5 }
   0xb   :  { %823 = vmatpush3.bf16.msra.mxu0 %v873_v5 }
  0xd9   :  { %v81_v12 = vpop.f32.mrb[0].mxu0 }
  0xda   :  { %v88_v13 = vcombine.high %v81_v12, %v81_v12  ;;  %v95_v14 = vrot.slane %v81_v12, %v94_v11  ;;  %v818_v15 = vpop.f32.mrb[1].mxu0 }
  0xdb   :  { %v84_v17 = vpop.f32.mrb[2].mxu0 }
  0xdc   :  { %v102_v18 = vrot.slane %v88_v13, %v94_v11  ;;  %v103_v19 = vcombine.high %v95_v14, %v95_v14  ;;  %v111_v20 = vrot.slane %v95_v14, %v94_v11  ;;  %v819_v21 = vpop.f32.mrb[3].mxu0 }
  0xde   :  { %v104_v23 = vcombine.high %v102_v18, %v102_v18  ;;  %v118_v24 = vrot.slane %v102_v18, %v94_v11  ;;  %v125_v25 = vrot.slane %v103_v19, %v94_v11  ;;  %v133_v26 = vcombine.high %v111_v20, %v111_v20 }
  0xdf   :  { %v140_v27 = vrot.slane %v111_v20, %v991_v16 }
  0xe0   :  { %v132_v29 = vrot.slane %v104_v23, %v94_v11  ;;  %v134_v30 = vcombine.high %v118_v24, %v118_v24  ;;  %v135_v31 = vcombine.high %v125_v25, %v125_v25  ;;  %v144_v32 = vrot.slane %v125_v25, %v991_v16 }
  0xe1   :  { %v148_v33 = vrot.slane %v133_v26, %v991_v16  ;;  %v156_v34 = vrot.slane %v118_v24, %v991_v16  ;;  %v177_v35 = vmul.f32 %v140_v27, %v27_v22 }
  0xe2   :  { %v136_v36 = vcombine.high %v132_v29, %v132_v29  ;;  %v152_v37 = vrot.slane %v135_v31, %v991_v16  ;;  %v160_v38 = vrot.slane %v132_v29, %v991_v16  ;;  %v164_v39 = vrot.slane %v134_v30, %v991_v16 }
  0xe3   :  { %v178_v40 = vmul.f32 %v144_v32, %v27_v22  ;;  %v179_v41 = vmul.f32 %v148_v33, %v27_v22  ;;  %v181_v42 = vmul.f32 %v156_v34, %v27_v22  ;;  %v1006_v43 = vadd.f32 %v177_v35, %v28_v28 }
  0xe4   :  { %v168_v44 = vrot.slane %v136_v36, %v991_v16  ;;  %v180_v45 = vmul.f32 %v152_v37, %v27_v22  ;;  %v182_v46 = vmul.f32 %v160_v38, %v27_v22  ;;  %v183_v47 = vmul.f32 %v164_v39, %v27_v22 }
  0xe5   :  { %v186_v48 = vadd.f32 %v178_v40, %v28_v28  ;;  %v187_v49 = vadd.f32 %v179_v41, %v28_v28  ;;  %v1011_v52 = vadd.f32 %v181_v42, %v28_v28  ;;  %v201_v55 = vmul.f32 0.044715, %v1006_v43 }
  0xe6   :  { %v184_v50 = vmul.f32 %v168_v44, %v27_v22  ;;  %v1009_v51 = vadd.f32 %v180_v45, %v28_v28  ;;  %v1013_v53 = vadd.f32 %v182_v46, %v28_v28  ;;  %v1017_v58 = vadd.f32 %v183_v47, %v28_v28 }
  0xe7   :  { %v203_v54 = vmul.f32 0.044715, %v187_v49  ;;  %v202_v56 = vmul.f32 0.044715, %v186_v48  ;;  %v209_v60 = vmul.f32 %v201_v55, %v1006_v43  ;;  %v205_v0 = vmul.f32 0.044715, %v1011_v52 }
  0xe8   :  { %v204_v57 = vmul.f32 0.044715, %v1009_v51  ;;  %v1019_v59 = vadd.f32 %v184_v50, %v28_v28  ;;  %v206_v1 = vmul.f32 0.044715, %v1013_v53  ;;  %v207_v11 = vmul.f32 0.044715, %v1017_v58 }
  0xe9   :  { %v211_v61 = vmul.f32 %v203_v54, %v187_v49  ;;  %v210_v62 = vmul.f32 %v202_v56, %v186_v48  ;;  %v217_v2 = vmul.f32 %v209_v60, %v1006_v43  ;;  %v213_v6 = vmul.f32 %v205_v0, %v1011_v52 }
  0xea   :  { %v212_v63 = vmul.f32 %v204_v57, %v1009_v51  ;;  %v214_v7 = vmul.f32 %v206_v1, %v1013_v53  ;;  %v208_v12 = vmul.f32 0.044715, %v1019_v59  ;;  %v215_v20 = vmul.f32 %v207_v11, %v1017_v58 }
  0xeb   :  { %v219_v3 = vmul.f32 %v211_v61, %v187_v49  ;;  %v218_v4 = vmul.f32 %v210_v62, %v186_v48  ;;  %v225_v8 = vadd.f32 %v217_v2, %v1006_v43  ;;  %v221_v15 = vmul.f32 %v213_v6, %v1011_v52 }
  0xec   :  { %v220_v5 = vmul.f32 %v212_v63, %v1009_v51  ;;  %v222_v17 = vmul.f32 %v214_v7, %v1013_v53  ;;  %v216_v21 = vmul.f32 %v208_v12, %v1019_v59  ;;  %v223_v26 = vmul.f32 %v215_v20, %v1017_v58 }
  0xed   :  { %v227_v9 = vadd.f32 %v219_v3, %v187_v49  ;;  %v226_v13 = vadd.f32 %v218_v4, %v186_v48  ;;  %v233_v18 = vmul.f32 0.7978846, %v225_v8  ;;  %v229_v24 = vadd.f32 %v221_v15, %v1011_v52  ;;  %v874_v8 = vld [vmem:[%s1219_s4] sm:$0xff]  }
  0xee   :  { %v228_v14 = vadd.f32 %v220_v5, %v1009_v51  ;;  %v230_v25 = vadd.f32 %v222_v17, %v1013_v53  ;;  %v224_v27 = vmul.f32 %v216_v21, %v1019_v59  ;;  %v231_v30 = vadd.f32 %v223_v26, %v1017_v58  ;;  %832 = vmatprep.subr.bf16.mxu0 %v874_v8 }
  0xef   :  { %v235_v19 = vmul.f32 0.7978846, %v227_v9  ;;  %v234_v22 = vmul.f32 0.7978846, %v226_v13  ;;  %884 = vtanh.f32 %v233_v18  ;;  %v237_v28 = vmul.f32 0.7978846, %v229_v24 }
  0xf0   :  { %v236_v23 = vmul.f32 0.7978846, %v228_v14  ;;  %v238_v29 = vmul.f32 0.7978846, %v230_v25  ;;  %v232_v31 = vadd.f32 %v224_v27, %v1019_v59  ;;  %v239_v32 = vmul.f32 0.7978846, %v231_v30 }
  0xf1   :  { %886 = vtanh.f32 %v234_v22  ;;  %v193_v38 = vmul.f32 0.5, %v1006_v43  ;;  %v194_v39 = vmul.f32 0.5, %v186_v48  ;;  %v195_v42 = vmul.f32 0.5, %v187_v49 }
  0xf2   :  { %888 = vtanh.f32 %v235_v19  ;;  %v240_v33 = vmul.f32 0.7978846, %v232_v31  ;;  %v196_v50 = vmul.f32 0.5, %v1009_v51  ;;  %v197_v56 = vmul.f32 0.5, %v1011_v52 }
  0xf3   :  { %890 = vtanh.f32 %v236_v23  ;;  %v198_v57 = vmul.f32 0.5, %v1013_v53  ;;  %v200_v52 = vmul.f32 0.5, %v1019_v59  ;;  %v199_v53 = vmul.f32 0.5, %v1017_v58  ;;  %v875_v59 = vld [vmem:[%s1219_s4 + $0x8] sm:$0xff]   ;;  %v29_v58 = vld [vmem:[%s1218_s2 + $0x10] sm:$0xff] }
  0xf4   :  { %892 = vtanh.f32 %v237_v28 }
  0xf5   :  { %894 = vtanh.f32 %v238_v29 }
  0xf6   :  { %896 = vtanh.f32 %v239_v32 }
  0xf7   :  { %898 = vtanh.f32 %v240_v33 }
  0xf9   :  { %v885_v34 = vpop.eup %884 }
  0xfa   :  { %v249_v36 = vadd.f32 1.0, %v885_v34 }
  0xfb   :  { %v887_v35 = vpop.eup %886 }
  0xfc   :  { %v889_v37 = vpop.eup %888  ;;  %v250_v40 = vadd.f32 1.0, %v887_v35  ;;  %v257_v46 = vmul.f32 %v249_v36, %v193_v38 }
  0xfd   :  { %v891_v41 = vpop.eup %890  ;;  %v251_v44 = vadd.f32 1.0, %v889_v37 }
  0xfe   :  { %v893_v45 = vpop.eup %892  ;;  %v258_v47 = vmul.f32 %v250_v40, %v194_v39  ;;  %v252_v54 = vadd.f32 1.0, %v891_v41 }
  0xff   :  { %v895_v55 = vpop.eup %894  ;;  %v253_v60 = vadd.f32 1.0, %v893_v45  ;;  %v259_v48 = vmul.f32 %v251_v44, %v195_v42 }
 0x100   :  { %v897_v61 = vpop.eup %896  ;;  %v265_v43 = vpack.c.bf16 %v258_v47, %v257_v46  ;;  %v260_v62 = vmul.f32 %v252_v54, %v196_v50  ;;  %v254_v63 = vadd.f32 1.0, %v895_v55 }
 0x101   :  { %v899_v49 = vpop.eup %898  ;;  %v261_v1 = vmul.f32 %v253_v60, %v197_v56  ;;  %v255_v4 = vadd.f32 1.0, %v897_v61 }
 0x102   :  { %824 = vmatprep.mubr.msk.bf16.mxu0 %vm285_vm3, %v265_v43  ;;  %v266_v0 = vpack.c.bf16 %v260_v62, %v259_v48  ;;  %v262_v2 = vmul.f32 %v254_v63, %v198_v57  ;;  %v256_v51 = vadd.f32 1.0, %v899_v49 }
 0x103   :  { %v263_v6 = vmul.f32 %v255_v4, %v199_v53 }
 0x104   :  { %825 = vmatmul.mubr.msk.bf16.vlgmr.msra.gmra.mrb[4].mxu0 %vm285_vm3, %v266_v0  ;;  %v267_v3 = vpack.c.bf16 %v262_v2, %v261_v1  ;;  %v264_v5 = vmul.f32 %v256_v51, %v200_v52 }
 0x105   :  { %833 = vmatpush3.bf16.msra.mxu0 %v874_v8 }
 0x106   :  { %828 = vmatprep.mubr.msk.bf16.mxu0 %vm285_vm3, %v267_v3  ;;  %v268_v7 = vpack.c.bf16 %v264_v5, %v263_v6  ;;  %834 = vmatprep.subr.bf16.mxu0 %v875_v59 }
 0x109   :  { %835 = vmatpush3.bf16.msra.mxu0 %v875_v59 }
 0x10c   :  { %829 = vmatmul.mubr.msk.bf16.gmra.mrb[8].mxu0 %vm285_vm3, %v268_v7 }
 0x1d7   :  { %v826_v9 = vpop.f32.mrb[4].mxu0 }
 0x1d8   :  { %v1062_v11 = vadd.f32 %v826_v9, %v29_v58  ;;  %v332_v12 = vpop.f32.mrb[5].mxu0 }
 0x1d9   :  { %v1064_v13 = vadd.f32 %v332_v12, %v29_v58  ;;  %v827_v14 = vpop.f32.mrb[6].mxu0 }
 0x1da   :  { %v381_v15 = vmul.f32 0.044715, %v1062_v11  ;;  %v1067_v17 = vadd.f32 %v827_v14, %v29_v58  ;;  %v335_v18 = vpop.f32.mrb[7].mxu0  ;;  %v373_v9 = vmul.f32 0.5, %v1062_v11 }
 0x1db   :  { %v379_v19 = vmul.f32 0.044715, %v1064_v13  ;;  %v1070_v20 = vadd.f32 %v335_v18, %v29_v58 }
 0x1dc   :  { %v389_v21 = vmul.f32 %v381_v15, %v1062_v11  ;;  %v382_v22 = vmul.f32 0.044715, %v1067_v17  ;;  %v374_v12 = vmul.f32 0.5, %v1067_v17  ;;  %v371_v15 = vmul.f32 0.5, %v1064_v13 }
 0x1dd   :  { %v387_v23 = vmul.f32 %v379_v19, %v1064_v13  ;;  %v380_v24 = vmul.f32 0.044715, %v1070_v20  ;;  %v372_v18 = vmul.f32 0.5, %v1070_v20 }
 0x1de   :  { %v397_v25 = vmul.f32 %v389_v21, %v1062_v11  ;;  %v390_v26 = vmul.f32 %v382_v22, %v1067_v17 }
 0x1df   :  { %v395_v27 = vmul.f32 %v387_v23, %v1064_v13  ;;  %v388_v28 = vmul.f32 %v380_v24, %v1070_v20  ;;  %v830_v29 = vpop.f32.mrb[8].mxu0 }
 0x1e0   :  { %v405_v30 = vadd.f32 %v397_v25, %v1062_v11  ;;  %v398_v31 = vmul.f32 %v390_v26, %v1067_v17  ;;  %v1082_v32 = vadd.f32 %v830_v29, %v29_v58  ;;  %v348_v33 = vpop.f32.mrb[9].mxu0 }
 0x1e1   :  { %v403_v34 = vadd.f32 %v395_v27, %v1064_v13  ;;  %v396_v35 = vmul.f32 %v388_v28, %v1070_v20  ;;  %v1086_v36 = vadd.f32 %v348_v33, %v29_v58  ;;  %v831_v37 = vpop.f32.mrb[10].mxu0 }
 0x1e2   :  { %v413_v38 = vmul.f32 0.7978846, %v405_v30  ;;  %v406_v39 = vadd.f32 %v398_v31, %v1067_v17  ;;  %v385_v40 = vmul.f32 0.044715, %v1082_v32  ;;  %v370_v41 = vadd.f32 %v831_v37, %v29_v58  ;;  %v351_v42 = vpop.f32.mrb[11].mxu0 }
 0x1e3   :  { %v411_v44 = vmul.f32 0.7978846, %v403_v34  ;;  %v404_v45 = vadd.f32 %v396_v35, %v1070_v20  ;;  %v383_v46 = vmul.f32 0.044715, %v1086_v36  ;;  %v368_v47 = vadd.f32 %v351_v42, %v29_v58 }
 0x1e4   :  { %900 = vtanh.f32 %v413_v38  ;;  %v414_v50 = vmul.f32 0.7978846, %v406_v39  ;;  %v393_v54 = vmul.f32 %v385_v40, %v1082_v32  ;;  %v386_v55 = vmul.f32 0.044715, %v370_v41 }
 0x1e5   :  { %902 = vtanh.f32 %v411_v44  ;;  %v412_v56 = vmul.f32 0.7978846, %v404_v45  ;;  %v391_v57 = vmul.f32 %v383_v46, %v1086_v36  ;;  %v384_v60 = vmul.f32 0.044715, %v368_v47  ;;  %v879_v45 = vld [vmem:[%s1220_s5 + $0x18] sm:$0xff]   ;;  %v880_v46 = vld [vmem:[%s1220_s5 + $0x20] sm:$0xff]  }
 0x1e6   :  { %904 = vtanh.f32 %v414_v50  ;;  %v401_v61 = vmul.f32 %v393_v54, %v1082_v32  ;;  %v394_v43 = vmul.f32 %v386_v55, %v370_v41  ;;  %v377_v13 = vmul.f32 0.5, %v1082_v32  ;;  %v882_v50 = vld [vmem:[%s1220_s5 + $0x30] sm:$0xff]   ;;  %v883_v54 = vld [vmem:[%s1220_s5 + $0x38] sm:$0xff]   ;;  %v1135_v55 = vld [vmem:[%s1221_s6] sm:$0x3] }
 0x1e7   :  { %906 = vtanh.f32 %v412_v56  ;;  %v399_v48 = vmul.f32 %v391_v57, %v1086_v36  ;;  %v392_v62 = vmul.f32 %v384_v60, %v368_v47  ;;  %v378_v20 = vmul.f32 0.5, %v370_v41 }
 0x1e8   :  { %v409_v63 = vadd.f32 %v401_v61, %v1082_v32  ;;  %v402_v49 = vmul.f32 %v394_v43, %v370_v41  ;;  %v375_v33 = vmul.f32 0.5, %v1086_v36  ;;  %v376_v34 = vmul.f32 0.5, %v368_v47  ;;  %v876_v32 = vld [vmem:[%s1220_s5] sm:$0xff]  }
 0x1e9   :  { %v407_v0 = vadd.f32 %v399_v48, %v1086_v36  ;;  %v400_v1 = vmul.f32 %v392_v62, %v368_v47  ;;  %844 = vmatprep.subr.bf16.mxu1 %v876_v32  ;;  %v877_v36 = vld [vmem:[%s1220_s5 + $0x8] sm:$0xff]   ;;  %v454_v56 = vrot.slane %v1135_v55, %v991_v16 }
 0x1ea   :  { %v417_v2 = vmul.f32 0.7978846, %v409_v63  ;;  %v410_v51 = vadd.f32 %v402_v49, %v370_v41  ;;  %845 = vmatpush3.bf16.msra.mxu1 %v876_v32  ;;  %v878_v41 = vld [vmem:[%s1220_s5 + $0x10] sm:$0xff]  }
 0x1eb   :  { %v415_v3 = vmul.f32 0.7978846, %v407_v0  ;;  %v408_v52 = vadd.f32 %v400_v1, %v368_v47  ;;  %846 = vmatprep.subr.bf16.mxu1 %v877_v36  ;;  %v881_v47 = vld [vmem:[%s1220_s5 + $0x28] sm:$0xff]  }
 0x1ec   :  { %908 = vtanh.f32 %v417_v2  ;;  %v418_v4 = vmul.f32 0.7978846, %v410_v51 }
 0x1ed   :  { %910 = vtanh.f32 %v415_v3  ;;  %v416_v53 = vmul.f32 0.7978846, %v408_v52 }
 0x1ee   :  { %v901_v5 = vpop.eup %900  ;;  %912 = vtanh.f32 %v418_v4  ;;  %847 = vmatpush3.bf16.msra.mxu1 %v877_v36 }
 0x1ef   :  { %v903_v6 = vpop.eup %902  ;;  %v429_v7 = vadd.f32 1.0, %v901_v5  ;;  %914 = vtanh.f32 %v416_v53  ;;  %848 = vmatprep.subr.bf16.mxu1 %v878_v41 }
 0x1f0   :  { %v905_v8 = vpop.eup %904  ;;  %v427_v59 = vadd.f32 1.0, %v903_v6 }
 0x1f1   :  { %v907_v58 = vpop.eup %906  ;;  %v430_v14 = vadd.f32 1.0, %v905_v8  ;;  %v437_v21 = vmul.f32 %v429_v7, %v373_v9 }
 0x1f2   :  { %v428_v19 = vadd.f32 1.0, %v907_v58  ;;  %v435_v23 = vmul.f32 %v427_v59, %v371_v15  ;;  %849 = vmatpush3.bf16.msra.mxu1 %v878_v41 }
 0x1f3   :  { %v438_v22 = vmul.f32 %v430_v14, %v374_v12  ;;  %850 = vmatprep.subr.bf16.mxu1 %v879_v45 }
 0x1f4   :  { %v436_v24 = vmul.f32 %v428_v19, %v372_v18 }
 0x1f5   :  { %v444_v25 = vpack.c.bf16 %v438_v22, %v437_v21 }
 0x1f6   :  { %v909_v26 = vpop.eup %908  ;;  %v443_v27 = vpack.c.bf16 %v436_v24, %v435_v23  ;;  %851 = vmatpush3.bf16.msra.mxu1 %v879_v45 }
 0x1f7   :  { %v911_v28 = vpop.eup %910  ;;  %v433_v29 = vadd.f32 1.0, %v909_v26  ;;  %852 = vmatprep.subr.bf16.mxu1 %v880_v46 }
 0x1f8   :  { %v913_v30 = vpop.eup %912  ;;  %836 = vmatprep.mubr.msk.bf16.mxu0 %vm285_vm3, %v443_v27  ;;  %v431_v11 = vadd.f32 1.0, %v911_v28 }
 0x1f9   :  { %v915_v17 = vpop.eup %914  ;;  %837 = vmatmul.mubr.msk.bf16.vlgmr.msra.gmra.mrb[12].mxu0 %vm285_vm3, %v444_v25  ;;  %v434_v31 = vadd.f32 1.0, %v913_v30  ;;  %v441_v37 = vmul.f32 %v433_v29, %v377_v13 }
 0x1fa   :  { %v432_v35 = vadd.f32 1.0, %v915_v17  ;;  %v439_v39 = vmul.f32 %v431_v11, %v375_v33  ;;  %853 = vmatpush3.bf16.msra.mxu1 %v880_v46 }
 0x1fb   :  { %v442_v38 = vmul.f32 %v434_v31, %v378_v20  ;;  %854 = vmatprep.subr.bf16.mxu1 %v881_v47 }
 0x1fc   :  { %v440_v40 = vmul.f32 %v432_v35, %v376_v34 }
 0x1fd   :  { %v446_v42 = vpack.c.bf16 %v442_v38, %v441_v37 }
 0x1fe   :  { %v445_v44 = vpack.c.bf16 %v440_v40, %v439_v39  ;;  %855 = vmatpush3.bf16.msra.mxu1 %v881_v47 }
 0x1ff   :  { %856 = vmatprep.subr.bf16.mxu1 %v882_v50 }
 0x200   :  { %840 = vmatprep.mubr.msk.bf16.mxu0 %vm285_vm3, %v445_v44 }
 0x201   :  { %841 = vmatmul.mubr.msk.bf16.gmra.mrb[16].mxu0 %vm285_vm3, %v446_v42 }
 0x202   :  { %857 = vmatpush3.bf16.msra.mxu1 %v882_v50 }
 0x203   :  { %858 = vmatprep.subr.bf16.mxu1 %v883_v54 }
 0x206   :  { %859 = vmatpush3.bf16.msra.mxu1 %v883_v54 }
 0x2cc   :  { %v838_v57 = vpop.f32.mrb[12].mxu0 }
 0x2cd   :  { %v1139_v60 = vadd.f32 %v838_v57, %v454_v56  ;;  %v513_v61 = vpop.f32.mrb[13].mxu0 }
 0x2ce   :  { %v1141_v43 = vadd.f32 %v513_v61, %v454_v56  ;;  %v839_v48 = vpop.f32.mrb[14].mxu0 }
 0x2cf   :  { %v554_v62 = vmul.f32 0.044715, %v1139_v60  ;;  %v1144_v63 = vadd.f32 %v839_v48, %v454_v56  ;;  %v516_v49 = vpop.f32.mrb[15].mxu0  ;;  %v546_v57 = vmul.f32 0.5, %v1139_v60 }
 0x2d0   :  { %v552_v0 = vmul.f32 0.044715, %v1141_v43  ;;  %v1147_v1 = vadd.f32 %v516_v49, %v454_v56 }
 0x2d1   :  { %v562_v2 = vmul.f32 %v554_v62, %v1139_v60  ;;  %v555_v16 = vmul.f32 0.044715, %v1144_v63  ;;  %v547_v61 = vmul.f32 0.5, %v1144_v63  ;;  %v544_v62 = vmul.f32 0.5, %v1141_v43 }
 0x2d2   :  { %v553_v51 = vmul.f32 0.044715, %v1147_v1  ;;  %v560_v3 = vmul.f32 %v552_v0, %v1141_v43  ;;  %v545_v49 = vmul.f32 0.5, %v1147_v1 }
 0x2d3   :  { %v570_v52 = vmul.f32 %v562_v2, %v1139_v60  ;;  %v563_v4 = vmul.f32 %v555_v16, %v1144_v63 }
 0x2d4   :  { %v842_v53 = vpop.f32.mrb[16].mxu0  ;;  %v561_v5 = vmul.f32 %v553_v51, %v1147_v1  ;;  %v568_v6 = vmul.f32 %v560_v3, %v1141_v43 }
 0x2d5   :  { %v571_v7 = vmul.f32 %v563_v4, %v1144_v63  ;;  %v1158_v8 = vadd.f32 %v842_v53, %v454_v56  ;;  %v529_v59 = vpop.f32.mrb[17].mxu0  ;;  %v578_v58 = vadd.f32 %v570_v52, %v1139_v60 }
 0x2d6   :  { %v1161_v9 = vadd.f32 %v529_v59, %v454_v56  ;;  %v843_v12 = vpop.f32.mrb[18].mxu0  ;;  %v569_v14 = vmul.f32 %v561_v5, %v1147_v1  ;;  %v576_v15 = vadd.f32 %v568_v6, %v1141_v43 }
 0x2d7   :  { %v558_v18 = vmul.f32 0.044715, %v1158_v8  ;;  %v541_v19 = vadd.f32 %v843_v12, %v454_v56  ;;  %v532_v21 = vpop.f32.mrb[19].mxu0  ;;  %v579_v22 = vadd.f32 %v571_v7, %v1144_v63  ;;  %v586_v23 = vmul.f32 0.7978846, %v578_v58 }
 0x2d8   :  { %v556_v24 = vmul.f32 0.044715, %v1161_v9  ;;  %v533_v25 = vadd.f32 %v532_v21, %v454_v56  ;;  %v577_v26 = vadd.f32 %v569_v14, %v1147_v1  ;;  %v584_v27 = vmul.f32 0.7978846, %v576_v15 }
 0x2d9   :  { %v566_v28 = vmul.f32 %v558_v18, %v1158_v8  ;;  %v559_v29 = vmul.f32 0.044715, %v541_v19  ;;  %v587_v30 = vmul.f32 0.7978846, %v579_v22  ;;  %916 = vtanh.f32 %v586_v23 }
 0x2da   :  { %v564_v11 = vmul.f32 %v556_v24, %v1161_v9  ;;  %v557_v17 = vmul.f32 0.044715, %v533_v25  ;;  %v585_v13 = vmul.f32 0.7978846, %v577_v26  ;;  %918 = vtanh.f32 %v584_v27 }
 0x2db   :  { %v574_v20 = vmul.f32 %v566_v28, %v1158_v8  ;;  %v567_v31 = vmul.f32 %v559_v29, %v541_v19  ;;  %920 = vtanh.f32 %v587_v30  ;;  %v550_v63 = vmul.f32 0.5, %v1158_v8 }
 0x2dc   :  { %v572_v33 = vmul.f32 %v564_v11, %v1161_v9  ;;  %v565_v34 = vmul.f32 %v557_v17, %v533_v25  ;;  %922 = vtanh.f32 %v585_v13  ;;  %v551_v43 = vmul.f32 0.5, %v541_v19 }
 0x2dd   :  { %v575_v35 = vmul.f32 %v567_v31, %v541_v19  ;;  %v582_v37 = vadd.f32 %v574_v20, %v1158_v8  ;;  %v548_v1 = vmul.f32 0.5, %v1161_v9  ;;  %v549_v12 = vmul.f32 0.5, %v533_v25 }
 0x2de   :  { %v573_v38 = vmul.f32 %v565_v34, %v533_v25  ;;  %v580_v39 = vadd.f32 %v572_v33, %v1161_v9  ;;  %v638_v26 = vsub.s32 1, %v987_v10 }
 0x2df   :  { %v583_v40 = vadd.f32 %v575_v35, %v541_v19  ;;  %v590_v42 = vmul.f32 0.7978846, %v582_v37 }
 0x2e0   :  { %v581_v44 = vadd.f32 %v573_v38, %v533_v25  ;;  %v588_v32 = vmul.f32 0.7978846, %v580_v39  ;;  %v639_v27 = vrot.slane %v1135_v55, %v638_v26 }
 0x2e1   :  { %v591_v36 = vmul.f32 0.7978846, %v583_v40  ;;  %924 = vtanh.f32 %v590_v42 }
 0x2e2   :  { %v589_v41 = vmul.f32 0.7978846, %v581_v44  ;;  %926 = vtanh.f32 %v588_v32 }
 0x2e3   :  { %v917_v45 = vpop.eup %916  ;;  %928 = vtanh.f32 %v591_v36 }
 0x2e4   :  { %v919_v46 = vpop.eup %918  ;;  %v602_v47 = vadd.f32 1.0, %v917_v45  ;;  %930 = vtanh.f32 %v589_v41 }
 0x2e5   :  { %v921_v50 = vpop.eup %920  ;;  %v600_v54 = vadd.f32 1.0, %v919_v46 }
 0x2e6   :  { %v923_v56 = vpop.eup %922  ;;  %v603_v48 = vadd.f32 1.0, %v921_v50  ;;  %v610_v2 = vmul.f32 %v602_v47, %v546_v57 }
 0x2e7   :  { %v601_v0 = vadd.f32 1.0, %v923_v56  ;;  %v608_v51 = vmul.f32 %v600_v54, %v544_v62 }
 0x2e8   :  { %v611_v16 = vmul.f32 %v603_v48, %v547_v61 }
 0x2e9   :  { %v609_v3 = vmul.f32 %v601_v0, %v545_v49 }
 0x2ea   :  { %v617_v52 = vpack.c.bf16 %v611_v16, %v610_v2 }
 0x2eb   :  { %v925_v4 = vpop.eup %924  ;;  %v616_v53 = vpack.c.bf16 %v609_v3, %v608_v51 }
 0x2ec   :  { %v927_v5 = vpop.eup %926  ;;  %v606_v6 = vadd.f32 1.0, %v925_v4 }
 0x2ed   :  { %v929_v7 = vpop.eup %928  ;;  %860 = vmatprep.mubr.bf16.mxu1 %v616_v53  ;;  %v604_v60 = vadd.f32 1.0, %v927_v5 }
 0x2ee   :  { %v931_v59 = vpop.eup %930  ;;  %861 = vmatmul.mubr.bf16.vlgmr.msra.gmra.mrb[0].mxu1 %v617_v52  ;;  %v607_v58 = vadd.f32 1.0, %v929_v7  ;;  %v614_v15 = vmul.f32 %v606_v6, %v550_v63 }
 0x2ef   :  { %v605_v14 = vadd.f32 1.0, %v931_v59  ;;  %v612_v21 = vmul.f32 %v604_v60, %v548_v1 }
 0x2f0   :  { %v615_v18 = vmul.f32 %v607_v58, %v551_v43 }
 0x2f1   :  { %v613_v22 = vmul.f32 %v605_v14, %v549_v12 }
 0x2f2   :  { %v619_v23 = vpack.c.bf16 %v615_v18, %v614_v15 }
 0x2f3   :  { %v618_v24 = vpack.c.bf16 %v613_v22, %v612_v21 }
 0x2f5   :  { %864 = vmatprep.mubr.bf16.mxu1 %v618_v24 }
 0x2f6   :  { %865 = vmatmul.mubr.bf16.gmra.mrb[4].mxu1 %v619_v23 }
 0x3c1   :  { %v862_v28 = vpop.f32.mrb[0].mxu1 }
 0x3c2   :  { %v731_v8 = vadd.f32 %v862_v28, %v639_v27  ;;  %v722_v19 = vpop.f32.mrb[1].mxu1 }
 0x3c3   :  { %v723_v29 = vadd.f32 %v722_v19, %v639_v27  ;;  %v863_v9 = vpop.f32.mrb[2].mxu1 }
 0x3c4   :  { %756 = vst.msk [vmem:[%s1222_s7 + $0x10] sm:$0xff] %vm753_vm4, %v731_v8  ;;  %v734_v25 = vadd.f32 %v863_v9, %v639_v27  ;;  %v725_v30 = vpop.f32.mrb[3].mxu1 }
 0x3c5   :  { %754 = vst.msk [vmem:[%s1222_s7] sm:$0xff] %vm753_vm4, %v723_v29  ;;  %v726_v10 = vadd.f32 %v725_v30, %v639_v27 }
 0x3c6   :  { %757 = vst.msk [vmem:[%s1222_s7 + $0x18] sm:$0xff] %vm753_vm4, %v734_v25 }
 0x3c7   :  { %755 = vst.msk [vmem:[%s1222_s7 + $0x8] sm:$0xff] %vm753_vm4, %v726_v10 }
 0x3c9   :  { %v866_v55 = vpop.f32.mrb[4].mxu1 }
 0x3ca   :  { %v747_v11 = vadd.f32 %v866_v55, %v639_v27  ;;  %v738_v17 = vpop.f32.mrb[5].mxu1 }
 0x3cb   :  { %v739_v13 = vadd.f32 %v738_v17, %v639_v27  ;;  %v867_v20 = vpop.f32.mrb[6].mxu1 }
 0x3cc   :  { %760 = vst.msk [vmem:[%s1222_s7 + $0x30] sm:$0xff] %vm753_vm4, %v747_v11  ;;  %v750_v31 = vadd.f32 %v867_v20, %v639_v27  ;;  %v741_v33 = vpop.f32.mrb[7].mxu1 }
 0x3cd   :  { %758 = vst.msk [vmem:[%s1222_s7 + $0x20] sm:$0xff] %vm753_vm4, %v739_v13  ;;  %v742_v34 = vadd.f32 %v741_v33, %v639_v27 }
 0x3ce   :  { %761 = vst.msk [vmem:[%s1222_s7 + $0x38] sm:$0xff] %vm753_vm4, %v750_v31 }
 0x3cf   :  { %759 = vst.msk [vmem:[%s1222_s7 + $0x28] sm:$0xff] %vm753_vm4, %v742_v34 }

</bundles_post_ra>
